<compile_context>
chip_gen: v6e
topology: v6e:2x2x1
jax: 0.10.0
libtpu: 0.0.40
codegen_flags: <defaults>
</compile_context>

<pallas_src>
import jax
import jax.numpy as jnp
from jax.experimental import pallas as pl
from jax.experimental.pallas import tpu as pltpu


_VALID_OPS = ('+', 'SUM', '*', 'MUL', '/', 'DIV', 'MAX')


def _make_eltwise_kernel(operation, n_inputs):
    """Builds a kernel that folds `operation` left-to-right across n_inputs tiles."""

    def kernel(*refs):
        in_refs = refs[:n_inputs]
        out_ref = refs[n_inputs]
        x = in_refs[0][...]
        for r in in_refs[1:]:
            y = r[...]
            if operation in ('+', 'SUM'):
                x = x + y
            elif operation in ('*', 'MUL'):
                x = x * y
            elif operation in ('/', 'DIV'):
                x = x / y
            else:  # 'MAX'
                x = jnp.maximum(x, y)
        out_ref[...] = x

    return kernel


def eltwise_forward(operation, *inputs, donate_first_input=False,
                    max_tile_rows=None):
    """Pallas-backed equivalent of Eltwise.forward(*inputs)."""
    if operation not in _VALID_OPS:
        raise ValueError('forward Eltwise, unknown operator: %r' % operation)
    assert len(inputs) >= 1
    shape = inputs[0].shape
    dtype = inputs[0].dtype
    for x in inputs:
        assert x.shape == shape and x.dtype == dtype

    n = len(inputs)
    if n == 1:
        # Identity: no HBM round trip, no kernel launch.
        return inputs[0]

    total = 1
    for d in shape:
        total *= int(d)
    itemsize = jnp.dtype(dtype).itemsize

    # ---- Lane-dense 2-D view (rows, LANE). Prefer a LANE that divides total
    # exactly so no padding (and no full-array concatenate copy) is needed.
    LANE = None
    for cand in (512, 256, 128):
        if total >= cand and total % cand == 0:
            LANE = cand
            break
    if LANE is None:
        LANE = 128  # fall back: pad to next multiple of 128 (full copy, rare)
    padded_total = -(-total // LANE) * LANE
    pad = padded_total - total
    rows = padded_total // LANE

    flat = [x.reshape(-1) for x in inputs]
    if pad:
        # Pad with 1.0: harmless for MUL/DIV; padded region is sliced off.
        pad_block = jnp.ones((pad,), dtype=dtype)
        flat = [jnp.concatenate([f, pad_block]) for f in flat]
    views = [f.reshape(rows, LANE) for f in flat]

    # ---- Tile sizing: budget the double-buffered footprint of (n inputs +
    # 1 output) against a conservative VMEM budget that fits every TPU
    # generation (incl. v7x's 64 MiB physical VMEM).
    sublane_mult = 8 if itemsize >= 4 else (16 if itemsize == 2 else 32)
    VMEM_BUDGET = 40 << 20                       # total double-buffered bytes
    tile_bytes = max(LANE * itemsize * sublane_mult,
                     VMEM_BUDGET // (2 * (n + 1)))
    tile_r = max(sublane_mult,
                 (tile_bytes // (LANE * itemsize)) // sublane_mult * sublane_mult)
    if max_tile_rows is not None:
        tile_r = min(tile_r, max(sublane_mult, int(max_tile_rows)))
    TILE_R = min(rows, tile_r)
    grid = pl.cdiv(rows, TILE_R)                 # ragged last block is masked

    kernel = _make_eltwise_kernel(operation, n)
    spec = pl.BlockSpec((TILE_R, LANE), lambda i: (i, 0))

    cost = pl.CostEstimate(
        flops=(n - 1) * rows * LANE,
        transcendentals=0,
        bytes_accessed=(n + 1) * rows * LANE * itemsize,
    )
    footprint = 2 * (n + 1) * TILE_R * LANE * itemsize
    vmem_limit = int(min(48 << 20, max(32 << 20, footprint + (4 << 20))))

    call_kwargs = {}
    if donate_first_input:
        call_kwargs['input_output_aliases'] = {0: 0}

    out2d = pl.pallas_call(
        kernel,
        out_shape=jax.ShapeDtypeStruct((rows, LANE), dtype),
        grid_spec=pltpu.PrefetchScalarGridSpec(
            num_scalar_prefetch=0,
            grid=(grid,),
            in_specs=[spec] * n,
            out_specs=spec,
        ),
        compiler_params=pltpu.CompilerParams(
            dimension_semantics=("parallel",),
            vmem_limit_bytes=vmem_limit),
        cost_estimate=cost,
        **call_kwargs,
    )(*views)

    if pad:
        return out2d.reshape(-1)[:total].reshape(shape)
    return out2d.reshape(shape)


if __name__ == "__main__":
    key = jax.random.PRNGKey(0)
    k1, k2, k3 = jax.random.split(key, 3)

    # --- Case A: lane-aligned shape (no padding, single block) -------------
    N, C, H, W = 2, 4, 16, 16
    a = jax.random.normal(k1, (N, C, H, W), dtype=jnp.float32)
    b = jax.random.normal(k2, (N, C, H, W), dtype=jnp.float32)
    c = jax.random.uniform(k3, (N, C, H, W), dtype=jnp.float32,
                           minval=0.5, maxval=1.5)
    b_safe = jnp.abs(b) + 0.5
    c_safe = jnp.abs(c) + 0.5

    cases = {
        '+':   ((a, b, c),           a + b + c),
        '*':   ((a, b, c),           a * b * c),
        'MAX': ((a, b, c),           jnp.maximum(jnp.maximum(a, b), c)),
        '/':   ((a, b_safe, c_safe), (a / b_safe) / c_safe),
    }
    for op, (ins, ref) in cases.items():
        out = eltwise_forward(op, *ins)
        jax.block_until_ready(out)
        assert out.shape == (N, C, H, W) and out.dtype == jnp.float32
        assert bool(jnp.allclose(out, ref, rtol=1e-6, atol=1e-6)), (
            "mismatch for op %s" % op)

    # --- Case B: non-128-multiple total (exercises the padding fallback) ---
    ka, kb = jax.random.split(k1)
    p = jax.random.normal(ka, (3, 5, 7), dtype=jnp.float32)
    q = jnp.abs(jax.random.normal(kb, (3, 5, 7), dtype=jnp.float32)) + 0.5
    out = eltwise_forward('/', p, q)
    jax.block_until_ready(out)
    assert bool(jnp.allclose(out, p / q, rtol=1e-6, atol=1e-6))

    # --- Case C: multi-block grid with a ragged (masked) final block --------
    kr, ks = jax.random.split(k2)
    r = jax.random.normal(kr, (2, 4, 20, 64), dtype=jnp.float32)   # rows=20
    s = jax.random.normal(ks, (2, 4, 20, 64), dtype=jnp.float32)
    out = eltwise_forward('+', r, s, max_tile_rows=8)              # grid=3
    jax.block_until_ready(out)
    assert bool(jnp.allclose(out, r + s, rtol=1e-6, atol=1e-6))

    # --- Case D: single-input identity short-circuit -----------------------
    out = eltwise_forward('MAX', a)
    jax.block_until_ready(out)
    assert bool(jnp.array_equal(out, a))

    print("KERNEL_OK")
</pallas_src>

<mosaic_0001>
module attributes {stable_mosaic.version = 11 : i64} {
  func.func @kernel(%arg0: i32, %arg1: memref<4x512xf32, #tpu.memory_space<vmem>>, %arg2: memref<4x512xf32, #tpu.memory_space<vmem>>, %arg3: memref<4x512xf32, #tpu.memory_space<vmem>>, %arg4: memref<4x512xf32, #tpu.memory_space<vmem>>) attributes {dimension_semantics = [#tpu.dimension_semantics<parallel>], iteration_bounds = array<i64: 1>, scalar_prefetch = 0 : i64, scratch_operands = 0 : i64, tpu.core_type = #tpu.core_type<tc>, window_params = [{transform_indices = @transform_0, window_bounds = array<i64: 4, 512>}, {transform_indices = @transform_1, window_bounds = array<i64: 4, 512>}, {transform_indices = @transform_2, window_bounds = array<i64: 4, 512>}, {transform_indices = @transform_3, window_bounds = array<i64: 4, 512>}]} {
    %c0 = arith.constant 0 : index
    %c0_0 = arith.constant 0 : index
    %0 = vector.load %arg1[%c0, %c0_0] : memref<4x512xf32, #tpu.memory_space<vmem>>, vector<4x512xf32>
    %c0_1 = arith.constant 0 : index
    %c0_2 = arith.constant 0 : index
    %1 = vector.load %arg2[%c0_1, %c0_2] : memref<4x512xf32, #tpu.memory_space<vmem>>, vector<4x512xf32>
    %2 = arith.addf %0, %1 : vector<4x512xf32>
    %c0_3 = arith.constant 0 : index
    %c0_4 = arith.constant 0 : index
    %3 = vector.load %arg3[%c0_3, %c0_4] : memref<4x512xf32, #tpu.memory_space<vmem>>, vector<4x512xf32>
    %4 = arith.addf %2, %3 : vector<4x512xf32>
    %c0_5 = arith.constant 0 : index
    %c0_6 = arith.constant 0 : index
    %5 = vector.load %arg4[%c0_5, %c0_6] : memref<4x512xf32, #tpu.memory_space<vmem>>, vector<4x512xf32>
    tpu.vector_store %arg4[%c0_5, %c0_6], %4 {strides = array<i32>} : memref<4x512xf32, #tpu.memory_space<vmem>>, vector<4x512xf32>,
    return
  }
  func.func @transform_0(%arg0: i32) -> (i32, i32) {
    %c0_i32 = arith.constant 0 : i32
    %c0_i32_0 = arith.constant 0 : i32
    return %arg0, %c0_i32 : i32, i32
  }
  func.func @transform_1(%arg0: i32) -> (i32, i32) {
    %c0_i32 = arith.constant 0 : i32
    %c0_i32_0 = arith.constant 0 : i32
    return %arg0, %c0_i32 : i32, i32
  }
  func.func @transform_2(%arg0: i32) -> (i32, i32) {
    %c0_i32 = arith.constant 0 : i32
    %c0_i32_0 = arith.constant 0 : i32
    return %arg0, %c0_i32 : i32, i32
  }
  func.func @transform_3(%arg0: i32) -> (i32, i32) {
    %c0_i32 = arith.constant 0 : i32
    %c0_i32_0 = arith.constant 0 : i32
    return %arg0, %c0_i32 : i32, i32
  }
}

</mosaic_0001>

<bundles_post_ra>
// kernel: tpu_custom_call.1
= control target key start
LH: loop header
LB: loop body
LE: loop exit
PB: predicated region body
PF: predicated region fallthrough
CT: control target
= control target key end

     0   :  { %8 = vsyncpa [#allocation3], 0  ;;  %s204_s0 = inlined_call_operand.hbm [shape: f32[4,512], index: 0, kind: input, shape index: {}]   ;;  %s205_s1 = inlined_call_operand.hbm [shape: f32[4,512], index: 1, kind: input, shape index: {}]   ;;  %s206_s2 = inlined_call_operand.hbm [shape: f32[4,512], index: 2, kind: input, shape index: {}]   ;;  %s207_s3 = inlined_call_operand.hbm [shape: f32[4,512], index: 3, kind: output, shape index: {}]  }
   0x1   :  { %9 = vsyncpa [#allocation6], 0 }
   0x2   :  { %10 = vsyncpa [#allocation4], 0  ;;  %s168_s12 = smov [#allocation5]   ;;  %s169_s14 = smov [#allocation2]  }
   0x3   :  { %s27_s13 = sshll.u32 %s168_s12, 4  ;;  %s17_s15 = sshll.u32 %s169_s14, 4  ;;  %s28_s13 = int_to_ptr.vmem [resolvable:$true] %s27_s13  ;;  %s18_s15 = int_to_ptr.vmem [resolvable:$true] %s17_s15 }
   0x4   :  { %s90_s16 = scalar_lea.vmem %s28_s13, 256  ;;  %p95_p1 = scmp.lt.s32.totalorder %s28_s13, %s28_s13 }
   0x5   :  { %p91_p0 = scmp.ne.s32.totalorder %s28_s13, %s90_s16  ;;  %p96_p2 = scmp.lt.s32.totalorder %s90_s16, %s90_s16 }
   0x7   :  { %p97_p3 = por %p96_p2, %p95_p1 }
   0x9   :  { %p98_p4 = pnand %p97_p3, %p91_p0 }
   0xb   :  { %101 = shalt.err (!%p98_p4)
}
   0xc   :  { %30 = dma.hbm_to_vmem [thread:$0]  %s205_s1, 256, %s28_s13, [#allocation6]  }
   0xd   :  { %s110_s19 = scalar_lea.vmem %s18_s15, 256  ;;  %p115_p6 = scmp.lt.s32.totalorder %s18_s15, %s18_s15 }
   0xe   :  { %p111_p5 = scmp.ne.s32.totalorder %s18_s15, %s110_s19  ;;  %p116_p7 = scmp.lt.s32.totalorder %s110_s19, %s110_s19 }
  0x10   :  { %p117_p8 = por %p116_p7, %p115_p6 }
  0x12   :  { %p118_p9 = pnand %p117_p8, %p111_p5 }
  0x14   :  { %121 = shalt.err (!%p118_p9)
}
  0x15   :  { %20 = dma.hbm_to_vmem [thread:$0]  %s204_s0, 256, %s18_s15, [#allocation3]  }
  0x16   :  { %s170_s22 = smov [#allocation7]  }
  0x17   :  { %s37_s23 = sshll.u32 %s170_s22, 4  ;;  %s38_s23 = int_to_ptr.vmem [resolvable:$true] %s37_s23 }
  0x18   :  { %s130_s24 = scalar_lea.vmem %s38_s23, 256  ;;  %p135_p11 = scmp.lt.s32.totalorder %s38_s23, %s38_s23 }
  0x19   :  { %p131_p10 = scmp.ne.s32.totalorder %s38_s23, %s130_s24  ;;  %p136_p12 = scmp.lt.s32.totalorder %s130_s24, %s130_s24 }
  0x1b   :  { %p137_p13 = por %p136_p12, %p135_p11 }
  0x1d   :  { %p138_p0 = pnand %p137_p13, %p131_p10 }
  0x1f   :  { %141 = shalt.err (!%p138_p0)
}
  0x20   :  { %40 = dma.hbm_to_vmem [thread:$0]  %s206_s2, 256, %s38_s23, [#allocation6]  }
  0x21   :  { %162 = dma.done.wait [#allocation3], 256  }
  0x22   :  { %163 = vsyncadd [#allocation3], 4294967040 }
  0x23   :  { %164 = dma.done.wait [#allocation6], 512  }
  0x24   :  { %165 = vsyncadd [#allocation6], 4294966784  ;;  %v50_v0 = vld [vmem:[#allocation2] sm:$0xff]  ;;  %v52_v1 = vld [vmem:[#allocation5] sm:$0xff]  ;;  %s171_s0 = smov [#allocation8]  }
  0x25   :  { %v56_v2 = vld [vmem:[#allocation7] sm:$0xff]  ;;  %v54_v3 = vadd.f32 %v52_v1, %v50_v0  ;;  %v51_v4 = vld [vmem:[#allocation2 + $0x8] sm:$0xff]  ;;  %v53_v5 = vld [vmem:[#allocation5 + $0x8] sm:$0xff]  ;;  %s68_s26 = sshll.u32 %s171_s0, 4  ;;  %s69_s26 = int_to_ptr.vmem [resolvable:$true] %s68_s26 }
  0x26   :  { %v57_v6 = vld [vmem:[#allocation7 + $0x8] sm:$0xff]  ;;  %v55_v7 = vadd.f32 %v53_v5, %v51_v4  ;;  %s142_s2 = scalar_lea.vmem %s69_s26, 256  ;;  %p147_p2 = scmp.lt.s32.totalorder %s69_s26, %s69_s26 }
  0x27   :  { %v58_v8 = vadd.f32 %v56_v2, %v54_v3  ;;  %p143_p1 = scmp.ne.s32.totalorder %s69_s26, %s142_s2  ;;  %p148_p3 = scmp.lt.s32.totalorder %s142_s2, %s142_s2 }
  0x28   :  { %v59_v9 = vadd.f32 %v57_v6, %v55_v7 }
  0x29   :  { %60 = vst [vmem:[#allocation8] sm:$0xff] %v58_v8  ;;  %p149_p4 = por %p148_p3, %p147_p2 }
  0x2a   :  { %61 = vst [vmem:[#allocation8 + $0x8] sm:$0xff] %v59_v9 }
  0x2b   :  { %p150_p5 = pnand %p149_p4, %p143_p1 }
  0x2d   :  { %153 = shalt.err (!%p150_p5)
}
  0x2e   :  { %71 = dma.vmem_to_hbm [thread:$0]  %s69_s26, 256, %s207_s3, [#allocation4]  }
  0x2f   :  { %166 = dma.done.wait [#allocation4], 256  }
  0x30   :  { %167 = vsyncadd [#allocation4], 4294967040 }
  0x31   :  { %75 = vsyncpa [#allocation3], 1 }
  0x32   :  { %76 = vsyncpa [#allocation6], 1 }
  0x33   :  { %77 = vsyncpa [#allocation4], 1 }

</bundles_post_ra>
